<compile_context>
chip_gen: v7x
topology: tpu7x:2x2x1
jax: 0.10.0
libtpu: 0.0.40
codegen_flags: <defaults>
</compile_context>

<pallas_src>
import functools

import jax
import jax.numpy as jnp
from jax.experimental import pallas as pl
from jax.experimental.pallas import tpu as pltpu

LANES = 128
MAX_TILE_ROWS = 2048        # (2048, 128) f32 tile = 1 MiB
MIN_ROWS_PER_SPLIT = 2048   # don't bother with a megacore split below this


def _round_up(a, b):
    return ((a + b - 1) // b) * b


def _num_tensorcores():
    """2 on v7x (two TensorCores per chip), 1 on v5e/v6e (and anything unknown)."""
    try:
        kind = jax.devices()[0].device_kind.lower()
    except Exception:
        return 1
    return 2 if "7" in kind else 1


def _make_in_spec(tile_rows, idx_map, extra_buffering):
    if extra_buffering:
        try:
            # 3-deep input pipeline: hides DMA-issue gaps on v7x's fast HBM.
            return pl.BlockSpec((tile_rows, LANES), idx_map,
                                pipeline_mode=pl.Buffered(3))
        except Exception:  # older jax without pipeline_mode / Buffered
            pass
    return pl.BlockSpec((tile_rows, LANES), idx_map)


def _bce_blur_kernel(pred_ref, true_ref, out_ref, *, inv_alpha, tile_rows,
                     blocks_per_split, total_blocks, valid_rows,
                     mask_last_block, has_extra_blocks, use_approx_recip):
    s = pl.program_id(0)   # TensorCore split ("parallel"; size 1 on v5e/v6e)
    i = pl.program_id(1)   # row-block within split ("arbitrary" reduction axis)
    blk = s * blocks_per_split + i

    @pl.when(i == 0)
    def _init():
        out_ref[...] = jnp.zeros_like(out_ref)

    x = pred_ref[...].astype(jnp.float32)
    y = true_ref[...].astype(jnp.float32)

    # e = exp(-|x|) is reused by both the stable BCE log1p term and the sigmoid,
    # saving one EUP transcendental per element.
    e = jnp.exp(-jnp.abs(x))
    bce = jnp.maximum(x, 0.0) - x * y + jnp.log1p(e)   # BCEWithLogits, 'none'
    num = jnp.where(x >= 0.0, 1.0, e)
    if use_approx_recip:
        # EUP vrcp (near-free slot on v7x); perturbs sigmoid by ~2^-12 relative.
        p = num * pl.reciprocal(1.0 + e, approx=True)
    else:
        p = num / (1.0 + e)                            # == sigmoid(x), exact
    dx = p - y
    loss = bce * (1.0 - jnp.exp((dx - 1.0) * inv_alpha))

    def _accum(vals):
        # Per-lane (8,128) accumulation: pure VPU adds, no cross-lane reduce,
        # no SMEM round-trip.  Final reduce + mean happens once in the wrapper.
        part = jnp.sum(vals.reshape(tile_rows // 8, 8, LANES), axis=0)
        out_ref[...] += part[None, :, :]

    if has_extra_blocks:
        in_range = blk < total_blocks   # skip clamped replay blocks

        def guard(c):
            return jnp.logical_and(in_range, c)
    else:
        def guard(c):
            return c

    if mask_last_block:
        is_last = blk == total_blocks - 1

        @pl.when(guard(jnp.logical_not(is_last)))
        def _full_tiles():        # all tiles except the ragged last one: no mask
            _accum(loss)

        @pl.when(guard(is_last))
        def _ragged_tile():       # only the final tile pays the row-mask cost
            r = jax.lax.broadcasted_iota(jnp.int32, (tile_rows, LANES), 0)
            valid = (r + blk * tile_rows) < valid_rows
            _accum(jnp.where(valid, loss, 0.0))
    elif has_extra_blocks:
        @pl.when(in_range)
        def _tiles():
            _accum(loss)
    else:
        _accum(loss)


def bce_blur_with_logits_loss(pred, true, alpha=0.05, use_approx_recip=None):
    """pred, true: same shape (e.g. NCHW), any float dtype. Returns scalar f32 mean."""
    assert pred.shape == true.shape, (pred.shape, true.shape)
    n = pred.size
    if n == 0:
        return jnp.float32(jnp.nan)   # matches torch mean of an empty tensor
    assert n < 2 ** 38, "in-kernel int32 row-index math would overflow"
    inv_alpha = float(1.0 / (alpha + 0.0001))

    num_tc = _num_tensorcores()
    if use_approx_recip is None:
        # v7x: HBM is fast enough that the single EUP slot binds; approx vrcp helps.
        use_approx_recip = num_tc > 1

    pred_flat = jnp.ravel(pred)
    true_flat = jnp.ravel(true)

    rows = n // LANES
    n_main = rows * LANES
    tail = n - n_main

    # <128-element ragged tail (only when n % 128 != 0): plain jnp, negligible.
    if tail:
        tail_sum = jnp.sum(_elementwise_loss(
            pred_flat[n_main:], true_flat[n_main:], inv_alpha))
    else:
        tail_sum = jnp.float32(0.0)

    if rows == 0:
        return tail_sum / n

    # Zero-copy reshape of the lane-aligned prefix into a lane-dense slab.
    pred2d = pred_flat[:n_main].reshape(rows, LANES)
    true2d = true_flat[:n_main].reshape(rows, LANES)

    # --- tiling / megacore split --------------------------------------------
    nsplit = num_tc if (num_tc > 1 and rows >= num_tc * MIN_ROWS_PER_SPLIT) else 1
    tile_rows = min(MAX_TILE_ROWS, _round_up(rows, 8))
    if nsplit > 1:
        # Keep >= ~4 row-blocks per TensorCore so ceil-split imbalance is small.
        target_blocks = 4 * nsplit
        tile_rows = min(tile_rows,
                        max(8, _round_up(pl.cdiv(rows, target_blocks), 8)))
    total_blocks = pl.cdiv(rows, tile_rows)
    if total_blocks < nsplit:
        nsplit = 1
    blocks_per_split = pl.cdiv(total_blocks, nsplit)

    has_extra_blocks = nsplit * blocks_per_split != total_blocks
    mask_last_block = (rows % tile_rows) != 0

    if has_extra_blocks:
        def idx_map(s, i):
            # Clamp out-of-range replay blocks (skipped in-kernel) onto the last
            # real block so the auto-DMA never leaves the array.
            return (jnp.minimum(s * blocks_per_split + i, total_blocks - 1), 0)
    else:
        def idx_map(s, i):
            return (s * blocks_per_split + i, 0)

    in_spec = _make_in_spec(
        tile_rows, idx_map,
        extra_buffering=(num_tc > 1 and blocks_per_split > 2))

    kernel = functools.partial(
        _bce_blur_kernel,
        inv_alpha=inv_alpha,
        tile_rows=tile_rows,
        blocks_per_split=blocks_per_split,
        total_blocks=total_blocks,
        valid_rows=rows,
        mask_last_block=mask_last_block,
        has_extra_blocks=has_extra_blocks,
        use_approx_recip=bool(use_approx_recip),
    )

    cost = pl.CostEstimate(
        flops=18 * n_main,
        transcendentals=(3 if use_approx_recip else 4) * n_main,
        bytes_accessed=n_main * (pred2d.dtype.itemsize + true2d.dtype.itemsize)
        + nsplit * 8 * LANES * 4,
    )

    partials = pl.pallas_call(
        kernel,
        out_shape=jax.ShapeDtypeStruct((nsplit, 8, LANES), jnp.float32),
        grid_spec=pltpu.PrefetchScalarGridSpec(
            num_scalar_prefetch=0,
            grid=(nsplit, blocks_per_split),
            in_specs=[in_spec, in_spec],
            out_specs=pl.BlockSpec((1, 8, LANES), lambda s, i: (s, 0, 0)),
        ),
        compiler_params=pltpu.CompilerParams(
            dimension_semantics=("parallel", "arbitrary")),
        cost_estimate=cost,
    )(pred2d, true2d)

    # Single final cross-lane reduce + mean, done once in the wrapper.
    return (jnp.sum(partials) + tail_sum) / n


def _elementwise_loss(x, y, inv_alpha):
    """Same math as the kernel body (exact divide), for the <128-elem tail."""
    x = x.astype(jnp.float32)
    y = y.astype(jnp.float32)
    e = jnp.exp(-jnp.abs(x))
    bce = jnp.maximum(x, 0.0) - x * y + jnp.log1p(e)
    p = jnp.where(x >= 0.0, 1.0, e) / (1.0 + e)
    return bce * (1.0 - jnp.exp((p - y - 1.0) * inv_alpha))


def _reference(pred, true, alpha=0.05):
    x = pred.astype(jnp.float32)
    y = true.astype(jnp.float32)
    bce = jnp.maximum(x, 0.0) - x * y + jnp.log1p(jnp.exp(-jnp.abs(x)))
    p = jax.nn.sigmoid(x)
    dx = p - y
    af = 1.0 - jnp.exp((dx - 1.0) / (alpha + 0.0001))
    return jnp.mean(bce * af)


if __name__ == "__main__":
    key = jax.random.PRNGKey(0)
    k1, k2 = jax.random.split(key)
    # NCHW-style logits and binary targets, as the YOLOv5 loss would see them.
    pred = jax.random.normal(k1, (2, 4, 16, 16), dtype=jnp.float32)
    true = (jax.random.uniform(k2, (2, 4, 16, 16)) > 0.5).astype(jnp.float32)

    out = bce_blur_with_logits_loss(pred, true, alpha=0.05)
    out = jax.block_until_ready(out)

    ref = _reference(pred, true, alpha=0.05)
    # The approximate reciprocal is auto-enabled only on 2-TC chips (v7x) and
    # perturbs the sigmoid by ~2^-12 relative; widen tolerance only in that case.
    rtol = 5e-3 if _num_tensorcores() > 1 else 1e-5
    assert jnp.allclose(out, ref, rtol=rtol, atol=1e-6), (out, ref)

    print("KERNEL_OK")
</pallas_src>

<mosaic_0001>
module attributes {stable_mosaic.version = 11 : i64} {
  func.func @_bce_blur_kernel(%arg0: i32, %arg1: i32, %arg2: memref<16x128xf32, #tpu.memory_space<vmem>>, %arg3: memref<16x128xf32, #tpu.memory_space<vmem>>, %arg4: memref<1x8x128xf32, #tpu.memory_space<vmem>>) attributes {dimension_semantics = [#tpu.dimension_semantics<parallel>, #tpu.dimension_semantics<arbitrary>], iteration_bounds = array<i64: 1, 1>, scalar_prefetch = 0 : i64, scratch_operands = 0 : i64, tpu.core_type = #tpu.core_type<tc>, window_params = [{transform_indices = @transform_0, window_bounds = array<i64: 16, 128>}, {transform_indices = @transform_1, window_bounds = array<i64: 16, 128>}, {transform_indices = @transform_2, window_bounds = array<i64: 1, 8, 128>}]} {
    %c0_i32 = arith.constant 0 : i32
    %0 = arith.cmpi eq, %arg1, %c0_i32 : i32
    %1 = arith.extui %0 : i1 to i32
    %c0_i32_0 = arith.constant 0 : i32
    %2 = arith.cmpi ne, %1, %c0_i32_0 : i32
    scf.if %2 {
      %cst_18 = arith.constant 0.000000e+00 : f32
      %37 = vector.broadcast %cst_18 : f32 to vector<1x8x128xf32>
      %c0_19 = arith.constant 0 : index
      %c0_20 = arith.constant 0 : index
      %c0_21 = arith.constant 0 : index
      %38 = vector.load %arg4[%c0_19, %c0_20, %c0_21] : memref<1x8x128xf32, #tpu.memory_space<vmem>>, vector<1x8x128xf32>
      tpu.vector_store %arg4[%c0_19, %c0_20, %c0_21], %37 {strides = array<i32>} : memref<1x8x128xf32, #tpu.memory_space<vmem>>, vector<1x8x128xf32>,
    } else {
    }
    %c0 = arith.constant 0 : index
    %c0_1 = arith.constant 0 : index
    %3 = vector.load %arg2[%c0, %c0_1] : memref<16x128xf32, #tpu.memory_space<vmem>>, vector<16x128xf32>
    %c0_2 = arith.constant 0 : index
    %c0_3 = arith.constant 0 : index
    %4 = vector.load %arg3[%c0_2, %c0_3] : memref<16x128xf32, #tpu.memory_space<vmem>>, vector<16x128xf32>
    %5 = math.absf %3 : vector<16x128xf32>
    %cst = arith.constant 0.000000e+00 : f32
    %6 = vector.broadcast %cst : f32 to vector<16x128xf32>
    %7 = arith.subf %6, %5 : vector<16x128xf32>
    %8 = math.exp %7 : vector<16x128xf32>
    %cst_4 = arith.constant 0.000000e+00 : f32
    %9 = vector.broadcast %cst_4 : f32 to vector<16x128xf32>
    %10 = arith.maximumf %3, %9 : vector<16x128xf32>
    %11 = arith.mulf %3, %4 : vector<16x128xf32>
    %12 = arith.subf %10, %11 : vector<16x128xf32>
    %13 = math.log1p %8 : vector<16x128xf32>
    %14 = arith.addf %12, %13 : vector<16x128xf32>
    %cst_5 = arith.constant 0.000000e+00 : f32
    %15 = vector.broadcast %cst_5 : f32 to vector<16x128xf32>
    %16 = arith.cmpf oge, %3, %15 : vector<16x128xf32>
    %cst_6 = arith.constant 1.000000e+00 : f32
    %17 = vector.broadcast %cst_6 : f32 to vector<16x128xf32>
    %18 = arith.select %16, %17, %8 : vector<16x128xi1>, vector<16x128xf32>
    %cst_7 = arith.constant 1.000000e+00 : f32
    %19 = vector.broadcast %cst_7 : f32 to vector<16x128xf32>
    %20 = arith.addf %19, %8 : vector<16x128xf32>
    %21 = arith.divf %18, %20 : vector<16x128xf32>
    %22 = arith.subf %21, %4 : vector<16x128xf32>
    %cst_8 = arith.constant 1.000000e+00 : f32
    %23 = vector.broadcast %cst_8 : f32 to vector<16x128xf32>
    %24 = arith.subf %22, %23 : vector<16x128xf32>
    %cst_9 = arith.constant 19.9600792 : f32
    %25 = vector.broadcast %cst_9 : f32 to vector<16x128xf32>
    %26 = arith.mulf %24, %25 : vector<16x128xf32>
    %27 = math.exp %26 : vector<16x128xf32>
    %cst_10 = arith.constant 1.000000e+00 : f32
    %28 = vector.broadcast %cst_10 : f32 to vector<16x128xf32>
    %29 = arith.subf %28, %27 : vector<16x128xf32>
    %30 = arith.mulf %14, %29 : vector<16x128xf32>
    %31 = vector.shape_cast %30 : vector<16x128xf32> to vector<2x8x128xf32>
    %cst_11 = arith.constant dense<0.000000e+00> : vector<8x128xf32>
    %32 = vector.multi_reduction <add>, %31, %cst_11 [0] : vector<2x8x128xf32> to vector<8x128xf32>
    %c0_12 = arith.constant 0 : index
    %c0_13 = arith.constant 0 : index
    %c0_14 = arith.constant 0 : index
    %33 = vector.load %arg4[%c0_12, %c0_13, %c0_14] : memref<1x8x128xf32, #tpu.memory_space<vmem>>, vector<1x8x128xf32>
    %34 = vector.shape_cast %32 : vector<8x128xf32> to vector<1x8x128xf32>
    %35 = arith.addf %33, %34 : vector<1x8x128xf32>
    %c0_15 = arith.constant 0 : index
    %c0_16 = arith.constant 0 : index
    %c0_17 = arith.constant 0 : index
    %36 = vector.load %arg4[%c0_15, %c0_16, %c0_17] : memref<1x8x128xf32, #tpu.memory_space<vmem>>, vector<1x8x128xf32>
    tpu.vector_store %arg4[%c0_15, %c0_16, %c0_17], %35 {strides = array<i32>} : memref<1x8x128xf32, #tpu.memory_space<vmem>>, vector<1x8x128xf32>,
    return
  }
  func.func @transform_0(%arg0: i32, %arg1: i32) -> (i32, i32) {
    %c1_i32 = arith.constant 1 : i32
    %0 = arith.muli %arg0, %c1_i32 : i32
    %1 = arith.addi %0, %arg1 : i32
    %c0_i32 = arith.constant 0 : i32
    %c0_i32_0 = arith.constant 0 : i32
    return %1, %c0_i32 : i32, i32
  }
  func.func @transform_1(%arg0: i32, %arg1: i32) -> (i32, i32) {
    %c1_i32 = arith.constant 1 : i32
    %0 = arith.muli %arg0, %c1_i32 : i32
    %1 = arith.addi %0, %arg1 : i32
    %c0_i32 = arith.constant 0 : i32
    %c0_i32_0 = arith.constant 0 : i32
    return %1, %c0_i32 : i32, i32
  }
  func.func @transform_2(%arg0: i32, %arg1: i32) -> (i32, i32, i32) {
    %c0_i32 = arith.constant 0 : i32
    %c0_i32_0 = arith.constant 0 : i32
    %c0_i32_1 = arith.constant 0 : i32
    return %arg0, %c0_i32, %c0_i32_0 : i32, i32, i32
  }
}

</mosaic_0001>

<bundles_post_ra>
// kernel: tpu_custom_call.1
= control target key start
LH: loop header
LB: loop body
LE: loop exit
PB: predicated region body
PF: predicated region fallthrough
CT: control target
= control target key end

     0   :  { %7 = vsyncpa [#allocation3], 0  ;;  %s291_s0 = inlined_call_operand.hbm [shape: f32[16,128], index: 0, kind: input, shape index: {}]   ;;  %s292_s1 = inlined_call_operand.hbm [shape: f32[16,128], index: 1, kind: input, shape index: {}]   ;;  %s293_s2 = inlined_call_operand.hbm [shape: f32[1,8,128], index: 2, kind: output, shape index: {}]  }
   0x1   :  { %8 = vsyncpa [#allocation6], 0 }
   0x2   :  { %9 = vsyncpa [#allocation4], 0  ;;  %s235_s9 = smov [#allocation2]   ;;  %s163_s13 = scalar_lea.hbm %s291_s0, 256 }
   0x3   :  { %s19_s10 = sshll.u32 %s235_s9, 4  ;;  %p164_p0 = scmp.ne.s32.totalorder %s291_s0, %s163_s13  ;;  %s20_s10 = int_to_ptr.vmem [resolvable:$true] %s19_s10 }
   0x4   :  { %p167_p1 = scmp.lt.u32.totalorder %s163_s13, %s291_s0 }
   0x6   :  { %p169_p2 = pnand %p167_p1, %p164_p0 }
   0x8   :  { %172 = shalt.err (!%p169_p2)
}
   0x9   :  { %s173_s18 = scalar_lea.vmem %s20_s10, 256  ;;  %p178_p4 = scmp.lt.s32.totalorder %s20_s10, %s20_s10 }
   0xa   :  { %p174_p3 = scmp.ne.s32.totalorder %s20_s10, %s173_s18  ;;  %p179_p5 = scmp.lt.s32.totalorder %s173_s18, %s173_s18 }
   0xc   :  { %p180_p6 = por %p179_p5, %p178_p4 }
   0xe   :  { %p181_p7 = pnand %p180_p6, %p174_p3 }
  0x10   :  { %184 = shalt.err (!%p181_p7)
}
  0x11   :  { %s236_s19 = smov 128   ;;  %s237_s20 = smov 8  }
  0x12   :  { %25 = dma.hbm_to_vmem [thread:$0]  %s291_s0, 256, %s20_s10, [#allocation3], %s236_s19, %s236_s19, %s237_s20  }
  0x13   :  { %s238_s23 = smov [#allocation5]   ;;  %s185_s27 = scalar_lea.hbm %s292_s1, 256 }
  0x14   :  { %s35_s24 = sshll.u32 %s238_s23, 4  ;;  %p186_p8 = scmp.ne.s32.totalorder %s292_s1, %s185_s27  ;;  %s36_s24 = int_to_ptr.vmem [resolvable:$true] %s35_s24 }
  0x15   :  { %p189_p9 = scmp.lt.u32.totalorder %s185_s27, %s292_s1 }
  0x17   :  { %p191_p10 = pnand %p189_p9, %p186_p8 }
  0x19   :  { %194 = shalt.err (!%p191_p10)
}
  0x1a   :  { %s195_s4 = scalar_lea.vmem %s36_s24, 256  ;;  %p200_p12 = scmp.lt.s32.totalorder %s36_s24, %s36_s24 }
  0x1b   :  { %p196_p11 = scmp.ne.s32.totalorder %s36_s24, %s195_s4  ;;  %p201_p13 = scmp.lt.s32.totalorder %s195_s4, %s195_s4 }
  0x1d   :  { %p202_p0 = por %p201_p13, %p200_p12 }
  0x1f   :  { %p203_p1 = pnand %p202_p0, %p196_p11 }
  0x21   :  { %206 = shalt.err (!%p203_p1)
}
  0x22   :  { %41 = dma.hbm_to_vmem [thread:$0]  %s292_s1, 256, %s36_s24, [#allocation6], %s236_s19, %s236_s19, %s237_s20  }
  0x23   :  { %229 = dma.done.wait [#allocation3], 256  }
  0x24   :  { %230 = vsyncadd [#allocation3], 4294967040 }
  0x25   :  { %231 = dma.done.wait [#allocation6], 256  }
  0x26   :  { %232 = vsyncadd [#allocation6], 4294967040  ;;  %v57_v0 = vld [vmem:[#allocation2] sm:$0xff]  ;;  %v58_v1 = vld [vmem:[#allocation2 + $0x8] sm:$0xff]  ;;  %s239_s1 = smov [#allocation7]  }
  0x27   :  { %v61_v2 = vand.u32 2147483647, %v57_v0  ;;  %v62_v3 = vand.u32 2147483647, %v58_v1  ;;  %vm95_vm0 = vcmp.ge.f32.partialorder %v57_v0, 0.0  ;;  %vm96_vm1 = vcmp.ge.f32.partialorder %v58_v1, 0.0 }
  0x28   :  { %v59_v15 = vld [vmem:[#allocation5] sm:$0xff]  ;;  %v60_v17 = vld [vmem:[#allocation5 + $0x8] sm:$0xff]  ;;  %v69_v36 = vmax.f32 %v57_v0, 0.0  ;;  %v70_v38 = vmax.f32 %v58_v1, 0.0  ;;  %s129_s6 = sshll.u32 %s239_s1, 4  ;;  %s130_s6 = int_to_ptr.vmem [resolvable:$true] %s129_s6 }
  0x29   :  { %v63_v4 = vsub.f32 0.0, %v61_v2  ;;  %v64_v5 = vsub.f32 0.0, %v62_v3  ;;  %v71_v37 = vmul.f32 %v59_v15, %v57_v0  ;;  %v72_v39 = vmul.f32 %v60_v17, %v58_v1  ;;  %s207_s7 = scalar_lea.vmem %s130_s6, 128  ;;  %p212_p3 = scmp.lt.s32.totalorder %s130_s6, %s130_s6 }
  0x2a   :  { %p208_p2 = scmp.ne.s32.totalorder %s130_s6, %s207_s7  ;;  %p213_p4 = scmp.lt.s32.totalorder %s207_s7, %s207_s7 }
  0x2b   :  { %v65_v6 = vmul.f32 1.442695, %v63_v4  ;;  %v67_v7 = vmul.f32 1.442695, %v64_v5  ;;  %v73_v44 = vsub.f32 %v69_v36, %v71_v37  ;;  %v74_v45 = vsub.f32 %v70_v38, %v72_v39 }
  0x2c   :  { %p214_p5 = por %p213_p4, %p212_p3 }
  0x2d   :  { %147 = vpow2.f32 %v65_v6 }
  0x2e   :  { %149 = vpow2.f32 %v67_v7  ;;  %p215_p6 = pnand %p214_p5, %p208_p2 }
  0x37   :  { %v148_v8 = vpop.eup %147 }
  0x38   :  { %v150_v9 = vpop.eup %149  ;;  %v75_v10 = vadd.f32 1.0, %v148_v8  ;;  %v97_v12 = vsel %vm95_vm0, 1.0, %v148_v8  ;;  %v78_v22 = vmul.f32 -0.5, %v148_v8  ;;  %v81_v31 = vand.u32 2147483647, %v148_v8 }
  0x39   :  { %v84_v11 = vadd.f32 1.0, %v150_v9  ;;  %v98_v13 = vsel %vm96_vm1, 1.0, %v150_v9  ;;  %v87_v24 = vmul.f32 -0.5, %v150_v9  ;;  %v90_v35 = vand.u32 2147483647, %v150_v9 }
  0x3a   :  { %151 = vrcp.f32 %v75_v10  ;;  %v79_v28 = vadd.f32 1.0, %v78_v22  ;;  %vm82_vm2 = vcmp.lt.f32.partialorder %v81_v31, 0.0004427343 }
  0x3b   :  { %153 = vrcp.f32 %v84_v11  ;;  %v88_v32 = vadd.f32 1.0, %v87_v24  ;;  %vm91_vm3 = vcmp.lt.f32.partialorder %v90_v35, 0.0004427343 }
  0x3c   :  { %155 = vlog2.f32 %v75_v10  ;;  %v80_v41 = vmul.f32 %v148_v8, %v79_v28 }
  0x3d   :  { %157 = vlog2.f32 %v84_v11  ;;  %v89_v43 = vmul.f32 %v150_v9, %v88_v32 }
  0x44   :  { %v152_v14 = vpop.eup %151 }
  0x45   :  { %v154_v16 = vpop.eup %153  ;;  %v102_v18 = vmul.f32 %v152_v14, %v97_v12 }
  0x46   :  { %v104_v19 = vmul.f32 %v154_v16, %v98_v13  ;;  %v156_v30 = vpop.eup %155 }
  0x47   :  { %v105_v20 = vsub.f32 %v102_v18, %v59_v15  ;;  %v158_v34 = vpop.eup %157  ;;  %v77_v40 = vmul.f32 0.6931472, %v156_v30 }
  0x48   :  { %v106_v21 = vsub.f32 %v104_v19, %v60_v17  ;;  %v86_v42 = vmul.f32 0.6931472, %v158_v34 }
  0x49   :  { %v139_v23 = vadd.f32 -1.0, %v105_v20  ;;  %v83_v46 = vsel %vm82_vm2, %v80_v41, %v77_v40 }
  0x4a   :  { %v140_v25 = vadd.f32 -1.0, %v106_v21  ;;  %v92_v47 = vsel %vm91_vm3, %v89_v43, %v86_v42  ;;  %v93_v48 = vadd.f32 %v83_v46, %v73_v44 }
  0x4b   :  { %v109_v26 = vmul.f32 19.96008, %v139_v23  ;;  %v94_v50 = vadd.f32 %v92_v47, %v74_v45 }
  0x4c   :  { %v110_v27 = vmul.f32 19.96008, %v140_v25 }
  0x4d   :  { %v111_v29 = vmul.f32 1.442695, %v109_v26 }
  0x4e   :  { %v113_v33 = vmul.f32 1.442695, %v110_v27 }
  0x4f   :  { %159 = vpow2.f32 %v111_v29 }
  0x50   :  { %161 = vpow2.f32 %v113_v33 }
  0x59   :  { %v160_v49 = vpop.eup %159 }
  0x5a   :  { %v162_v51 = vpop.eup %161  ;;  %v115_v52 = vsub.f32 1.0, %v160_v49 }
  0x5b   :  { %v116_v53 = vsub.f32 1.0, %v162_v51 }
  0x5c   :  { %v117_v54 = vmul.f32 %v115_v52, %v93_v48 }
  0x5d   :  { %v118_v55 = vmul.f32 %v116_v53, %v94_v50 }
  0x5f   :  { %v119_v56 = vadd.f32 %v118_v55, %v117_v54 }
  0x61   :  { %122 = vst [vmem:[#allocation7] sm:$0xff] %v119_v56 }
  0x62   :  { %218 = shalt.err (!%p215_p6)
}
  0x63   :  { %s219_s10 = scalar_lea.hbm %s293_s2, 128 }
  0x64   :  { %p220_p7 = scmp.ne.s32.totalorder %s293_s2, %s219_s10  ;;  %p223_p8 = scmp.lt.u32.totalorder %s219_s10, %s293_s2 }
  0x66   :  { %p225_p9 = pnand %p223_p8, %p220_p7 }
  0x68   :  { %228 = shalt.err (!%p225_p9)
}
  0x69   :  { %132 = dma.vmem_to_hbm [thread:$0]  %s130_s6, 128, %s293_s2, [#allocation4]  }
  0x6a   :  { %233 = dma.done.wait [#allocation4], 128  }
  0x6b   :  { %234 = vsyncadd [#allocation4], 4294967168 }
  0x6c   :  { %136 = vsyncpa [#allocation3], 1 }
  0x6d   :  { %137 = vsyncpa [#allocation6], 1 }
  0x6e   :  { %138 = vsyncpa [#allocation4], 1 }

</bundles_post_ra>
